<compile_context>
chip_gen: v7x
topology: tpu7x:2x2x1
jax: 0.10.0
libtpu: 0.0.40
codegen_flags: <defaults>
</compile_context>

<pallas_src>
import functools

import numpy as np
import jax
import jax.numpy as jnp
from jax.experimental import pallas as pl
from jax.experimental.pallas import tpu as pltpu

NUM_JOINTS = 22
PARENTS = np.array(
    [-1, 0, 1, 2, 3, 4, 0, 6, 7, 8, 0, 10, 11, 12, 3, 14, 15, 16, 3, 18, 19, 20]
)


# ----------------------------------------------------------------------------
# Pallas kernel: blended skinning transform, V on lanes.
#   T^T = A^T(12,J) @ W^T(J,tile_v)   -> (12, tile_v)      [MXU, lane-dense N]
#   y_r = T[4r]*x + T[4r+1]*y + T[4r+2]*z + T[4r+3]        [VPU, full vregs]
# ----------------------------------------------------------------------------
def _lbs_kernel(a_ref, w_ref, v_ref, o_ref):
    T = jnp.dot(a_ref[...], w_ref[...], preferred_element_type=jnp.float32)  # (12, tv)
    v = v_ref[...]                                                           # (3, tv)
    x = v[0:1, :]
    y = v[1:2, :]
    z = v[2:3, :]
    # Direct sublane-row writes: each store is a full-lane-width row.
    o_ref[0:1, :] = T[0:1, :] * x + T[1:2, :] * y + T[2:3, :] * z + T[3:4, :]
    o_ref[1:2, :] = T[4:5, :] * x + T[5:6, :] * y + T[6:7, :] * z + T[7:8, :]
    o_ref[2:3, :] = T[8:9, :] * x + T[9:10, :] * y + T[10:11, :] * z + T[11:12, :]


def _choose_tile_v(n_verts):
    # Large lane-dense tiles amortize the ~0.35us/grid-step overhead, but keep
    # >= 2 grid steps when possible so v7x's two TensorCores both get work.
    if n_verts <= 128:
        return 128
    for t in (1024, 512, 256, 128):
        if pl.cdiv(n_verts, t) >= 2:
            return t
    return 128


def lbs_skin_pallas(a_t, w_t, v_t, *, tile_v):
    """a_t (12,J) f32, w_t (J,V_pad) f32, v_t (3,V_pad) f32 -> (3,V_pad) f32."""
    twelve, J = a_t.shape
    _, V_pad = w_t.shape
    assert V_pad % tile_v == 0
    grid = (V_pad // tile_v,)
    return pl.pallas_call(
        _lbs_kernel,
        out_shape=jax.ShapeDtypeStruct((3, V_pad), jnp.float32),
        grid_spec=pltpu.PrefetchScalarGridSpec(
            num_scalar_prefetch=0,
            grid=grid,
            in_specs=[
                # A^T: tiny, constant block index -> stays VMEM-resident across steps.
                pl.BlockSpec((twelve, J), lambda i: (0, 0)),
                # W^T tile: (J, tile_v) -- lane axis is vertices (multiple of 128).
                pl.BlockSpec((J, tile_v), lambda i: (0, i)),
                # rest vertices tile: (3, tile_v), lane-dense.
                pl.BlockSpec((3, tile_v), lambda i: (0, i)),
            ],
            out_specs=pl.BlockSpec((3, tile_v), lambda i: (0, i)),
        ),
        compiler_params=pltpu.CompilerParams(dimension_semantics=("parallel",)),
    )(a_t, w_t, v_t)


# ----------------------------------------------------------------------------
# Glue (traced inside jit): quaternion -> rotmat, forward kinematics
# ----------------------------------------------------------------------------
def quat_to_rotmat(q):
    """q: (..., 4) in (w, x, y, z) convention. Returns (..., 3, 3)."""
    q = q / jnp.linalg.norm(q, axis=-1, keepdims=True)
    w, x, y, z = q[..., 0], q[..., 1], q[..., 2], q[..., 3]
    R = jnp.stack(
        [
            1 - 2 * (y * y + z * z), 2 * (x * y - w * z), 2 * (x * z + w * y),
            2 * (x * y + w * z), 1 - 2 * (x * x + z * z), 2 * (y * z - w * x),
            2 * (x * z - w * y), 2 * (y * z + w * x), 1 - 2 * (x * x + y * y),
        ],
        axis=-1,
    )
    return R.reshape(q.shape[:-1] + (3, 3))


def build_joint_transforms(body_pose, tpose_joints):
    """body_pose (1,J,4) quats; tpose_joints (J,3).
    Returns A^T of shape (12, J): flattened 3x4 skinning transforms, coeff-major."""
    Rs = quat_to_rotmat(body_pose[0])  # (J,3,3)
    Jp = tpose_joints

    g_R = [None] * NUM_JOINTS
    g_t = [None] * NUM_JOINTS
    g_R[0] = Rs[0]
    g_t[0] = Jp[0]
    for j in range(1, NUM_JOINTS):
        p = int(PARENTS[j])
        g_R[j] = g_R[p] @ Rs[j]
        g_t[j] = g_R[p] @ (Jp[j] - Jp[p]) + g_t[p]

    g_R = jnp.stack(g_R)                                   # (J,3,3)
    g_t = jnp.stack(g_t)                                   # (J,3)
    t_rel = g_t - jnp.einsum("jab,jb->ja", g_R, Jp)        # remove rest joint position
    A = jnp.concatenate([g_R, t_rel[:, :, None]], axis=2)  # (J,3,4)
    return A.reshape(NUM_JOINTS, 12).T.astype(jnp.float32)  # (12, J)


# ----------------------------------------------------------------------------
# One-time layout prep (module-init analogue): transpose + pad to lane-dense.
# ----------------------------------------------------------------------------
def precompute_mesh(rest_vertices, sk_weights):
    V, J = sk_weights.shape
    tile_v = _choose_tile_v(V)
    V_pad = pl.cdiv(V, tile_v) * tile_v
    # NOTE: weights kept f32 to preserve the module's f32 numerics exactly;
    # a bf16 W^T transfer would halve HBM traffic at ~1e-3 relative error.
    w_t = jnp.zeros((J, V_pad), jnp.float32).at[:, :V].set(
        jnp.asarray(sk_weights, jnp.float32).T)
    v_t = jnp.zeros((3, V_pad), jnp.float32).at[:, :V].set(
        jnp.asarray(rest_vertices, jnp.float32).T)
    return w_t, v_t, V, tile_v


# ----------------------------------------------------------------------------
# Jitted forward: reproduces MESH.forward() -> vertices (1, V, 3)
# ----------------------------------------------------------------------------
@functools.partial(jax.jit, static_argnames=("n_verts", "tile_v"))
def mesh_forward(body_pose, tpose, w_t, v_t, *, n_verts, tile_v):
    def lbs_branch(_):
        a_t = build_joint_transforms(body_pose, tpose[0])            # (12, J)
        out_t = lbs_skin_pallas(a_t, w_t, v_t, tile_v=tile_v)        # (3, V_pad)
        return out_t[:, :n_verts].T.reshape(1, n_verts, 3)

    def rest_branch(_):
        return v_t[:, :n_verts].T.reshape(1, n_verts, 3)

    pred = jnp.any(body_pose != 0)
    return jax.lax.cond(pred, lbs_branch, rest_branch, 0)


# ----------------------------------------------------------------------------
# Pure-JAX reference for validation
# ----------------------------------------------------------------------------
def mesh_forward_ref(body_pose, tpose, rest_vertices, sk_weights):
    A_t = build_joint_transforms(body_pose, tpose[0])       # (12, J)
    T = sk_weights @ A_t.T                                  # (V, 12)
    T = T.reshape(-1, 3, 4)
    v_h = jnp.concatenate(
        [rest_vertices, jnp.ones((rest_vertices.shape[0], 1), jnp.float32)], axis=1)
    out = jnp.einsum("vab,vb->va", T, v_h)
    return out.reshape(1, -1, 3)


if __name__ == "__main__":
    key = jax.random.PRNGKey(0)
    kv, kw, kj, kq = jax.random.split(key, 4)

    V = 1000  # deliberately NOT a multiple of 128 -> exercises padding path

    # fbx_data['rest_vertices'] -> (V, 3)
    rest_vertices = jax.random.normal(kv, (V, 3), dtype=jnp.float32)

    # fbx_data['skinning_weights'] -> (V, 22), rows sum to 1
    sk_weights = jax.nn.softmax(
        jax.random.normal(kw, (V, NUM_JOINTS), dtype=jnp.float32), axis=-1)

    # fbx_data['rest_faces'] -- pass-through metadata, no compute
    faces = np.arange(3 * 64, dtype=np.int32).reshape(64, 3) % V

    # tpose: (1, 22, 3) rest joint positions
    tpose = jax.random.normal(kj, (1, NUM_JOINTS, 3), dtype=jnp.float32)

    # body_pose: (1, 22, 4) quaternions (w,x,y,z), non-zero -> LBS branch
    q_noise = 0.1 * jax.random.normal(kq, (1, NUM_JOINTS, 4), dtype=jnp.float32)
    body_pose = q_noise.at[..., 0].add(1.0)
    body_pose = body_pose / jnp.linalg.norm(body_pose, axis=-1, keepdims=True)

    # one-time layout prep (module init analogue)
    w_t, v_t, n_verts, tile_v = precompute_mesh(rest_vertices, sk_weights)

    # --- posed branch: Pallas LBS kernel ---
    vertices = mesh_forward(body_pose, tpose, w_t, v_t, n_verts=n_verts, tile_v=tile_v)
    vertices = jax.block_until_ready(vertices)
    assert vertices.shape == (1, V, 3)

    ref = mesh_forward_ref(body_pose, tpose, rest_vertices, sk_weights)
    np.testing.assert_allclose(np.asarray(vertices), np.asarray(ref),
                               rtol=1e-4, atol=1e-4)

    # --- zero-pose branch: returns rest vertices (handled by lax.cond, no host sync) ---
    zero_pose = jnp.zeros((1, NUM_JOINTS, 4), dtype=jnp.float32)
    verts0 = mesh_forward(zero_pose, tpose, w_t, v_t, n_verts=n_verts, tile_v=tile_v)
    verts0 = jax.block_until_ready(verts0)
    np.testing.assert_allclose(np.asarray(verts0),
                               np.asarray(rest_vertices).reshape(1, V, 3),
                               rtol=0, atol=0)

    print("KERNEL_OK")
</pallas_src>

<mosaic_0001>
module attributes {stable_mosaic.version = 11 : i64} {
  func.func @_lbs_kernel(%arg0: i32, %arg1: memref<12x22xf32, #tpu.memory_space<vmem>>, %arg2: memref<22x512xf32, #tpu.memory_space<vmem>>, %arg3: memref<3x512xf32, #tpu.memory_space<vmem>>, %arg4: memref<3x512xf32, #tpu.memory_space<vmem>>) attributes {dimension_semantics = [#tpu.dimension_semantics<parallel>], iteration_bounds = array<i64: 2>, scalar_prefetch = 0 : i64, scratch_operands = 0 : i64, tpu.core_type = #tpu.core_type<tc>, window_params = [{pipeline_mode = #tpu.pipeline_mode<synchronous>, transform_indices = @transform_0, window_bounds = array<i64: 12, 22>}, {transform_indices = @transform_1, window_bounds = array<i64: 22, 512>}, {transform_indices = @transform_2, window_bounds = array<i64: 3, 512>}, {transform_indices = @transform_3, window_bounds = array<i64: 3, 512>}]} {
    %c0 = arith.constant 0 : index
    %c0_0 = arith.constant 0 : index
    %0 = vector.load %arg1[%c0, %c0_0] : memref<12x22xf32, #tpu.memory_space<vmem>>, vector<12x22xf32>
    %c0_1 = arith.constant 0 : index
    %c0_2 = arith.constant 0 : index
    %1 = vector.load %arg2[%c0_1, %c0_2] : memref<22x512xf32, #tpu.memory_space<vmem>>, vector<22x512xf32>
    %cst = arith.constant dense<0.000000e+00> : vector<12x512xf32>
    %2 = tpu.matmul %0, %1, %cst {dimension_numbers = #tpu.dot_dimension_numbers<[1], [0], [0], [1], [0, 0, 1, 1], [], []>} : vector<12x22xf32>, vector<22x512xf32>, vector<12x512xf32> -> vector<12x512xf32>
    %c0_3 = arith.constant 0 : index
    %c0_4 = arith.constant 0 : index
    %3 = vector.load %arg3[%c0_3, %c0_4] : memref<3x512xf32, #tpu.memory_space<vmem>>, vector<3x512xf32>
    %4 = vector.extract_strided_slice %3 {offsets = [0, 0], sizes = [1, 512], strides = [1, 1]} : vector<3x512xf32> to vector<1x512xf32>
    %5 = vector.extract_strided_slice %3 {offsets = [1, 0], sizes = [1, 512], strides = [1, 1]} : vector<3x512xf32> to vector<1x512xf32>
    %6 = vector.extract_strided_slice %3 {offsets = [2, 0], sizes = [1, 512], strides = [1, 1]} : vector<3x512xf32> to vector<1x512xf32>
    %7 = vector.extract_strided_slice %2 {offsets = [0, 0], sizes = [1, 512], strides = [1, 1]} : vector<12x512xf32> to vector<1x512xf32>
    %8 = arith.mulf %7, %4 : vector<1x512xf32>
    %9 = vector.extract_strided_slice %2 {offsets = [1, 0], sizes = [1, 512], strides = [1, 1]} : vector<12x512xf32> to vector<1x512xf32>
    %10 = arith.mulf %9, %5 : vector<1x512xf32>
    %11 = arith.addf %8, %10 : vector<1x512xf32>
    %12 = vector.extract_strided_slice %2 {offsets = [2, 0], sizes = [1, 512], strides = [1, 1]} : vector<12x512xf32> to vector<1x512xf32>
    %13 = arith.mulf %12, %6 : vector<1x512xf32>
    %14 = arith.addf %11, %13 : vector<1x512xf32>
    %15 = vector.extract_strided_slice %2 {offsets = [3, 0], sizes = [1, 512], strides = [1, 1]} : vector<12x512xf32> to vector<1x512xf32>
    %16 = arith.addf %14, %15 : vector<1x512xf32>
    %c0_5 = arith.constant 0 : index
    %c0_6 = arith.constant 0 : index
    %17 = vector.load %arg4[%c0_5, %c0_6] : memref<3x512xf32, #tpu.memory_space<vmem>>, vector<1x512xf32>
    tpu.vector_store %arg4[%c0_5, %c0_6], %16 {strides = array<i32>} : memref<3x512xf32, #tpu.memory_space<vmem>>, vector<1x512xf32>,
    %18 = vector.extract_strided_slice %2 {offsets = [4, 0], sizes = [1, 512], strides = [1, 1]} : vector<12x512xf32> to vector<1x512xf32>
    %19 = arith.mulf %18, %4 : vector<1x512xf32>
    %20 = vector.extract_strided_slice %2 {offsets = [5, 0], sizes = [1, 512], strides = [1, 1]} : vector<12x512xf32> to vector<1x512xf32>
    %21 = arith.mulf %20, %5 : vector<1x512xf32>
    %22 = arith.addf %19, %21 : vector<1x512xf32>
    %23 = vector.extract_strided_slice %2 {offsets = [6, 0], sizes = [1, 512], strides = [1, 1]} : vector<12x512xf32> to vector<1x512xf32>
    %24 = arith.mulf %23, %6 : vector<1x512xf32>
    %25 = arith.addf %22, %24 : vector<1x512xf32>
    %26 = vector.extract_strided_slice %2 {offsets = [7, 0], sizes = [1, 512], strides = [1, 1]} : vector<12x512xf32> to vector<1x512xf32>
    %27 = arith.addf %25, %26 : vector<1x512xf32>
    %c1 = arith.constant 1 : index
    %c0_7 = arith.constant 0 : index
    %28 = vector.load %arg4[%c1, %c0_7] : memref<3x512xf32, #tpu.memory_space<vmem>>, vector<1x512xf32>
    tpu.vector_store %arg4[%c1, %c0_7], %27 {strides = array<i32>} : memref<3x512xf32, #tpu.memory_space<vmem>>, vector<1x512xf32>,
    %29 = vector.extract_strided_slice %2 {offsets = [8, 0], sizes = [1, 512], strides = [1, 1]} : vector<12x512xf32> to vector<1x512xf32>
    %30 = arith.mulf %29, %4 : vector<1x512xf32>
    %31 = vector.extract_strided_slice %2 {offsets = [9, 0], sizes = [1, 512], strides = [1, 1]} : vector<12x512xf32> to vector<1x512xf32>
    %32 = arith.mulf %31, %5 : vector<1x512xf32>
    %33 = arith.addf %30, %32 : vector<1x512xf32>
    %34 = vector.extract_strided_slice %2 {offsets = [10, 0], sizes = [1, 512], strides = [1, 1]} : vector<12x512xf32> to vector<1x512xf32>
    %35 = arith.mulf %34, %6 : vector<1x512xf32>
    %36 = arith.addf %33, %35 : vector<1x512xf32>
    %37 = vector.extract_strided_slice %2 {offsets = [11, 0], sizes = [1, 512], strides = [1, 1]} : vector<12x512xf32> to vector<1x512xf32>
    %38 = arith.addf %36, %37 : vector<1x512xf32>
    %c2 = arith.constant 2 : index
    %c0_8 = arith.constant 0 : index
    %39 = vector.load %arg4[%c2, %c0_8] : memref<3x512xf32, #tpu.memory_space<vmem>>, vector<1x512xf32>
    tpu.vector_store %arg4[%c2, %c0_8], %38 {strides = array<i32>} : memref<3x512xf32, #tpu.memory_space<vmem>>, vector<1x512xf32>,
    return
  }
  func.func @transform_0(%arg0: i32) -> (i32, i32) {
    %c0_i32 = arith.constant 0 : i32
    %c0_i32_0 = arith.constant 0 : i32
    %c0_i32_1 = arith.constant 0 : i32
    return %c0_i32, %c0_i32_0 : i32, i32
  }
  func.func @transform_1(%arg0: i32) -> (i32, i32) {
    %c0_i32 = arith.constant 0 : i32
    %c0_i32_0 = arith.constant 0 : i32
    return %c0_i32, %arg0 : i32, i32
  }
  func.func @transform_2(%arg0: i32) -> (i32, i32) {
    %c0_i32 = arith.constant 0 : i32
    %c0_i32_0 = arith.constant 0 : i32
    return %c0_i32, %arg0 : i32, i32
  }
  func.func @transform_3(%arg0: i32) -> (i32, i32) {
    %c0_i32 = arith.constant 0 : i32
    %c0_i32_0 = arith.constant 0 : i32
    return %c0_i32, %arg0 : i32, i32
  }
}

</mosaic_0001>

<bundles_post_ra>
// kernel: squeeze.77
= control target key start
LH: loop header
LB: loop body
LE: loop exit
PB: predicated region body
PF: predicated region fallthrough
CT: control target
= control target key end

     0   :  { %vm7_vm0 = vcmask 23552   ;;  %s30_s8 = smov 122   ;;  %s47_s0 = inlined_call_operand.vmem [shape: f32[9], index: 0, kind: input, shape index: {}]   ;;  %s48_s1 = inlined_call_operand.vmem [shape: f32[3,3], index: 1, kind: output, shape index: {}]  }
   0x1   :  { %v4_v0 = vld [vmem:[%s47_s0] sm:$0x1]  ;;  %s29_s0 = smov 125  }
   0x2   :  { %5 = vst [vmem:[#allocation1] sm:$0x1] %v4_v0 }
   0x9   :  { %v9_v1 = vld [vmem:[#allocation1] sm:$0x1]  }
   0xa   :  { %v6_v2 = vld [vmem:[#allocation1] sm:$0x1]   ;;  %10 = vrot.lane.b32.xlu0 %v9_v1, %s29_s0 }
   0xb   :  { %8 = vst.msk [vmem:[#allocation0] sm:$0x1] %vm7_vm0, %v6_v2   ;;  %v15_v3 = vld [vmem:[#allocation1] sm:$0x1]  }
   0xe   :  { %16 = vrot.lane.b32.xlu0 %v15_v3, %s30_s8 }
  0x7c   :  { %v11_v4 = vpop.permute.xlu0 %10  }
  0x7d   :  { %14 = vst.msk [vmem:[#allocation0 + $0x1] sm:$0x1] %vm7_vm0, %v11_v4  }
  0x80   :  { %v17_v5 = vpop.permute.xlu0 %16  }
  0x81   :  { %20 = vst.msk [vmem:[#allocation0 + $0x2] sm:$0x1] %vm7_vm0, %v17_v5  }
  0x88   :  { %v24_v6 = vld [vmem:[#allocation0] sm:$0xf] }
  0x89   :  { %26 = vst [vmem:[%s48_s1] sm:$0xf] %v24_v6 }

// kernel: sub.12
= control target key start
LH: loop header
LB: loop body
LE: loop exit
PB: predicated region body
PF: predicated region fallthrough
CT: control target
= control target key end

     0   :  { %s78_s0 = inlined_call_operand.vmem [shape: f32[22,3,1], index: 0, kind: input, shape index: {}]   ;;  %s79_s1 = inlined_call_operand.vmem [shape: f32[22,3,1], index: 1, kind: input, shape index: {}]   ;;  %s80_s2 = inlined_call_operand.vmem [shape: f32[22,3,1], index: 2, kind: output, shape index: {}]  }
   0x1   :  { %v3_v0 = vld [vmem:[%s78_s0] sm:$0x1]  ;;  %v30_v2 = vld [vmem:[%s78_s0 + $0x1] sm:$0x1]  ;;  %v33_v5 = vld [vmem:[%s78_s0 + $0x2] sm:$0x1] }
   0x2   :  { %v4_v1 = vld [vmem:[%s79_s1] sm:$0x1]  ;;  %v31_v4 = vld [vmem:[%s79_s1 + $0x1] sm:$0x1]  ;;  %v34_v6 = vld [vmem:[%s79_s1 + $0x2] sm:$0x1] }
   0x3   :  { %v7_v3 = vsub.f32 %v3_v0, %v4_v1  ;;  %v16_v7 = vsub.f32 %v30_v2, %v31_v4  ;;  %v26_v8 = vsub.f32 %v33_v5, %v34_v6 }
   0x5   :  { %9 = vst [vmem:[%s80_s2] sm:$0x1] %v7_v3  ;;  %32 = vst [vmem:[%s80_s2 + $0x1] sm:$0x1] %v16_v7 }
   0x6   :  { %35 = vst [vmem:[%s80_s2 + $0x2] sm:$0x1] %v26_v8 }

// kernel: branch_1_fun.1
= control target key start
LH: loop header
LB: loop body
LE: loop exit
PB: predicated region body
PF: predicated region fallthrough
CT: control target
= control target key end

     0   :  { %s881_s12 = smov 0   ;;  %s883_s13 = smov 0   ;;  %s983_s0 = inlined_call_operand.vmem [shape: f32[12,22], index: 0, kind: input, shape index: {}]   ;;  %s984_s1 = inlined_call_operand.vmem [shape: f32[22,1024], index: 1, kind: input, shape index: {}]   ;;  %s985_s2 = inlined_call_operand.vmem [shape: f32[3,1024], index: 2, kind: input, shape index: {}]   ;;  %s986_s3 = inlined_call_operand.vmem [shape: f32[3,1024], index: 3, kind: output, shape index: {}]  }
   0x1   :  { %s885_s14 = smov 0  }
   0x2 LB: > { %s775_s15 = sadd.s32 4294967295, %s857_s14   ;;  %s898_s16 = sadd.s32 1, %s857_s14   ;;  %s857_s14 = sphi %s885_s14, %s989_s14   ;;  %s853_s13 = sphi %s883_s13, %s988_s13   ;;  %s849_s12 = sphi %s881_s12, %s987_s12  }
   0x3   : > { %s38_s17 = ssub.s32 %s857_s14, %s898_s16  ;;  %s41_s18 = sadd.s32 1, %s853_s13 }
   0x4   : > { %p39_p0 = scmp.eq.s32.totalorder %s38_s17, 0  ;;  %p48_p1 = scmp.ne.s32.totalorder %s853_s13, %s849_s12 }
   0x5   : > { %p49_p2 = scmp.eq.s32.totalorder %s857_s14, 0  ;;  %p778_p4 = scmp.ge.s32.totalorder %s857_s14, 2 }
   0x6   : > { %s907_s19 = scalar_select %p39_p0, %s853_s13, %s41_s18  }
   0x7   : > { %p50_p3 = por %p49_p2, %p48_p1  ;;  %129 = sbr.rel (%p778_p4) target bundleno = 25 (0x19), region = 20 }
   0xe   : > { %132 = sbr.rel (!%p50_p3) target bundleno = 25 (0x19), region = 24  ;;  %s134_s20 = sand.u32 (%p50_p3), 1, %s853_s13  }
   0xf   : > { %s798_s21 = sshll.u32 (%p50_p3), %s857_s14, 5  ;;  %s807_s22 = smul.u32 (%p50_p3), 96, %s134_s20 }
  0x10   : > { %s139_s25 = scalar_lea.vmem (%p50_p3), %s984_s1, %s798_s21 }
  0x11   : > { %v152_v0 = vld [vmem:[%s139_s25] sm:$0xff] (%p50_p3)  ;;  %v154_v1 = vld [vmem:[%s139_s25 + $0x8] sm:$0xff] (%p50_p3)  ;;  %v156_v2 = vld [vmem:[%s139_s25 + $0x10] sm:$0xff] (%p50_p3)  ;;  %s136_s26 = scalar_lea.vmem (%p50_p3), [#allocation2], %s807_s22 }
  0x12   : > { %v158_v3 = vld [vmem:[%s139_s25 + $0x18] sm:$0xff] (%p50_p3)  ;;  %v160_v4 = vld [vmem:[%s139_s25 + $0x40] sm:$0xff] (%p50_p3)  ;;  %v162_v5 = vld [vmem:[%s139_s25 + $0x48] sm:$0xff] (%p50_p3)  ;;  %153 = vst [vmem:[%s136_s26] sm:$0xff] (%p50_p3), %v152_v0 }
  0x13   : > { %155 = vst [vmem:[%s136_s26 + $0x8] sm:$0xff] (%p50_p3), %v154_v1  ;;  %157 = vst [vmem:[%s136_s26 + $0x10] sm:$0xff] (%p50_p3), %v156_v2  ;;  %v164_v6 = vld [vmem:[%s139_s25 + $0x50] sm:$0xff] (%p50_p3)  ;;  %v166_v7 = vld [vmem:[%s139_s25 + $0x58] sm:$0xff] (%p50_p3) }
  0x14   : > { %159 = vst [vmem:[%s136_s26 + $0x18] sm:$0xff] (%p50_p3), %v158_v3  ;;  %161 = vst [vmem:[%s136_s26 + $0x20] sm:$0xff] (%p50_p3), %v160_v4  ;;  %v168_v8 = vld [vmem:[%s139_s25 + $0x80] sm:$0xff] (%p50_p3)  ;;  %v170_v9 = vld [vmem:[%s139_s25 + $0x88] sm:$0xff] (%p50_p3) }
  0x15   : > { %163 = vst [vmem:[%s136_s26 + $0x28] sm:$0xff] %v162_v5  ;;  %165 = vst [vmem:[%s136_s26 + $0x30] sm:$0xff] %v164_v6  ;;  %v172_v10 = vld [vmem:[%s139_s25 + $0x90] sm:$0xff]  ;;  %v174_v11 = vld [vmem:[%s139_s25 + $0x98] sm:$0xff] }
  0x16   : > { %167 = vst [vmem:[%s136_s26 + $0x38] sm:$0xff] %v166_v7  ;;  %169 = vst [vmem:[%s136_s26 + $0x40] sm:$0xff] %v168_v8 }
  0x17   : > { %171 = vst [vmem:[%s136_s26 + $0x48] sm:$0xff] %v170_v9  ;;  %173 = vst [vmem:[%s136_s26 + $0x50] sm:$0xff] %v172_v10 }
  0x18   : > { %175 = vst [vmem:[%s136_s26 + $0x58] sm:$0xff] %v174_v11 }
  0x19 PF: > { %p781_p5 = scmp.ge.s32.totalorder %s857_s14, 1  ;;  %p189_p6 = scmp.lt.s32.totalorder %s857_s14, 3 }
  0x1b   : > { %p190_p7 = pnand %p781_p5, %p189_p6 }
  0x1c   : > { %s196_s27 = sand.u32 (!%p190_p7), 1, %s849_s12   ;;  %v859_v12 = vmov (!%p190_p7), 0.0   ;;  %vm258_vm0 = vcmask (!%p190_p7), 1045504   ;;  %v237_v29 = vld [vmem:[%s983_s0] sm:$0xff] (!%p190_p7)  ;;  %vm251_vm1 = vcmask (!%p190_p7), 179200   ;;  %s782_s7 = sshll.u32 (!%p190_p7), %s775_s15, 2  ;;  %v429_v31 = vlaneseq (!%p190_p7) }
  0x1d   : > { %193 = sbr.rel (%p190_p7) target bundleno = 287 (0x11f), region = 51  ;;  %335 = vmatprep.mubr.f32.mxu0 (!%p190_p7), %v859_v12  ;;  %412 = vmatprep.mubr.f32.mxu1 (!%p190_p7), %v859_v12  ;;  %v238_v30 = vld [vmem:[%s983_s0 + $0x8] sm:$0xf] (!%p190_p7)  ;;  %p226_p8 = scmp.lt.s32.totalorder (!%p190_p7), %s782_s7, 7  ;;  %v860_v46 = vmov (!%p190_p7), 1966171168  }
  0x1e   : > { %s808_s28 = smul.u32 (!%p190_p7), 96, %s196_s27  ;;  %v930_v32 = vshrl.u32 (!%p190_p7), %v429_v31, 7  ;;  %v943_v47 = vunpack.c.l.s4 (!%p190_p7), %v860_v46  ;;  %vm580_vm2 = vcmp.lt.s32.totalorder (!%p190_p7), %v429_v31, 512 }
  0x20   : > { %s198_s29 = scalar_lea.vmem (!%p190_p7), [#allocation2], %s808_s28  ;;  %v455_v33 = vsub.s32 (!%p190_p7), 1, %v930_v32  ;;  %v495_v34 = vsub.s32 (!%p190_p7), 2, %v930_v32  ;;  %v431_v36 = vsub.s32 (!%p190_p7), 0, %v930_v32  ;;  %v459_v38 = vsub.s32 (!%p190_p7), 5, %v930_v32 }
  0x21   : > { %v240_v13 = vld [vmem:[%s198_s29 + $0x8] sm:$0xff] (!%p190_p7)  ;;  %v242_v15 = vld [vmem:[%s198_s29 + $0x18] sm:$0xff] (!%p190_p7)  ;;  %v239_v18 = vld [vmem:[%s198_s29] sm:$0xff] (!%p190_p7)  ;;  %v435_v41 = vsub.s32 (!%p190_p7), 4, %v930_v32  ;;  %v499_v42 = vsub.s32 (!%p190_p7), 6, %v930_v32  ;;  %v557_v0 = vunpack.c.0.s8 (!%p190_p7), %v943_v47 }
  0x22   : > { %v244_v14 = vld [vmem:[%s198_s29 + $0x28] sm:$0xff] (!%p190_p7)  ;;  %v246_v17 = vld [vmem:[%s198_s29 + $0x38] sm:$0xff] (!%p190_p7)  ;;  %v243_v19 = vld [vmem:[%s198_s29 + $0x20] sm:$0xff] (!%p190_p7) }
  0x23   : > { %v799_v16 = vpack.c.bf16 (!%p190_p7), %v244_v14, %v240_v13  ;;  %v803_v20 = vpack.c.bf16 (!%p190_p7), %v246_v17, %v242_v15  ;;  %v801_v21 = vpack.c.bf16 (!%p190_p7), %v243_v19, %v239_v18  ;;  %v241_v22 = vld [vmem:[%s198_s29 + $0x10] sm:$0xff] (!%p190_p7)  ;;  %v248_v24 = vld [vmem:[%s198_s29 + $0x48] sm:$0x3f] (!%p190_p7)  ;;  %v250_v26 = vld [vmem:[%s198_s29 + $0x58] sm:$0x3f] (!%p190_p7) }
  0x24   : > { %v245_v23 = vld [vmem:[%s198_s29 + $0x30] sm:$0xff]  ;;  %v247_v27 = vld [vmem:[%s198_s29 + $0x40] sm:$0x3f]  ;;  %s991_s7 = smov (!%p226_p8, %s782_s7), 7 }
  0x25   : > { %800 = vmatprep.subr.bf16.mxu0 %v799_v16  ;;  %v805_v25 = vpack.c.bf16 %v245_v23, %v241_v22  ;;  %804 = vmatprep.subr.bf16.mxu1 %v803_v20  ;;  %v249_v28 = vld [vmem:[%s198_s29 + $0x50] sm:$0x3f]  ;;  %s783_s8 = sshll.u32 %s991_s7, 2 }
  0x26   : > { %802 = vmatpush1.bf16.msra.mxu0 %v801_v21  ;;  %s229_s11 = scalar_lea.vmem %s985_s2, %s783_s8  ;;  %s235_s15 = scalar_lea.vmem %s986_s3, %s783_s8 }
  0x27   : > { %806 = vmatpush1.bf16.msra.mxu1 %v805_v25  ;;  %786 = vmatprep.subr.msk.mxu0 %vm258_vm0, %v248_v24  ;;  %v425_v35 = vld [vmem:[%s229_s11] sm:$0x77]  ;;  %v426_v37 = vld [vmem:[%s229_s11 + $0x8] sm:$0x77] }
  0x28   : > { %790 = vmatprep.subr.msk.mxu1 %vm258_vm0, %v250_v26  ;;  %v456_v39 = vrot.slane %v425_v35, %v455_v33  ;;  %v496_v40 = vrot.slane %v425_v35, %v495_v34  ;;  %v464_v43 = vrot.slane %v426_v37, %v455_v33  ;;  %v504_v44 = vrot.slane %v426_v37, %v495_v34 }
  0x29   : > { %v432_v45 = vrot.slane %v425_v35, %v431_v36  ;;  %v440_v49 = vrot.slane %v426_v37, %v431_v36  ;;  %v460_v50 = vrot.slane %v425_v35, %v459_v38  ;;  %v436_v55 = vrot.slane %v425_v35, %v435_v41 }
  0x2a   : > { %787 = vmatpush1.msk.msra.mxu0 %vm258_vm0, %v247_v27  ;;  %v500_v56 = vrot.slane %v425_v35, %v499_v42  ;;  %v444_v60 = vrot.slane %v426_v37, %v435_v41  ;;  %v468_v61 = vrot.slane %v426_v37, %v459_v38  ;;  %v508_v1 = vrot.slane %v426_v37, %v499_v42 }
  0x2b   : > { %791 = vmatpush1.msk.msra.mxu1 %vm258_vm0, %v249_v28  ;;  %788 = vmatmul.mubr.msk.f32.vlgmr.msra.gmra.mrb[0].mxu0 %vm251_vm1, %v237_v29 }
  0x2c   : > { %792 = vmatmul.mubr.msk.f32.vlgmr.msra.gmra.mrb[0].mxu1 %vm251_vm1, %v237_v29  ;;  %341 = vmatprep.mubr.f32.mxu0 %v859_v12 }
  0x2d   : > { %418 = vmatprep.mubr.f32.mxu1 %v859_v12 }
  0x2f   : > { %789 = vmatmul.mubr.msk.f32.gmra.mrb[2].mxu0 %vm251_vm1, %v238_v30 }
  0x30   : > { %793 = vmatmul.mubr.msk.f32.gmra.mrb[2].mxu1 %vm251_vm1, %v238_v30 }
  0xfe   : > { %v337_v48 = vpop.f32.mrb[0].mxu0 }
  0xff   : > { %v473_v51 = vmul.f32 %v456_v39, %v337_v48  ;;  %v513_v52 = vmul.f32 %v496_v40, %v337_v48  ;;  %v945_v53 = vpop.f32.mrb[0].mxu1  ;;  %v339_v54 = vpop.f32.mrb[1].mxu0  ;;  %v449_v62 = vmul.f32 %v432_v45, %v337_v48  ;;  %v537_v2 = vrot.slane %v337_v48, 3 }
 0x100   : > { %v475_v57 = vmul.f32 %v464_v43, %v945_v53  ;;  %v515_v58 = vmul.f32 %v504_v44, %v945_v53  ;;  %v949_v59 = vpop.f32.mrb[1].mxu1  ;;  %v451_v3 = vmul.f32 %v440_v49, %v945_v53  ;;  %v474_v6 = vmul.f32 %v460_v50, %v339_v54 }
 0x101   : > { %v481_v63 = vrot.slane %v473_v51, 1  ;;  %v521_v8 = vrot.slane %v513_v52, 2  ;;  %v539_v9 = vrot.slane %v945_v53, 3  ;;  %v450_v21 = vmul.f32 %v436_v55, %v339_v54 }
 0x102   : > { %v483_v4 = vrot.slane %v475_v57, 1  ;;  %v343_v5 = vpop.f32.mrb[2].mxu0  ;;  %v523_v14 = vrot.slane %v515_v58, 2  ;;  %v482_v25 = vrot.slane %v474_v6, 1  ;;  %v538_v26 = vrot.slane %v339_v54, 3 }
 0x103   : > { %v489_v7 = vadd.f32 %v481_v63, %v449_v62  ;;  %v614_v10 = vmul.f32 %v456_v39, %v343_v5  ;;  %v420_v11 = vpop.f32.mrb[2].mxu1  ;;  %v345_v12 = vpop.f32.mrb[3].mxu0  ;;  %v634_v15 = vmul.f32 %v496_v40, %v343_v5  ;;  %v610_v18 = vmul.f32 %v432_v45, %v343_v5 }
 0x104   : > { %v491_v13 = vadd.f32 %v483_v4, %v451_v3  ;;  %v616_v16 = vmul.f32 %v464_v43, %v420_v11  ;;  %v954_v17 = vpop.f32.mrb[3].mxu1  ;;  %v636_v20 = vmul.f32 %v504_v44, %v420_v11  ;;  %v612_v23 = vmul.f32 %v440_v49, %v420_v11 }
 0x105   : > { %v622_v19 = vrot.slane %v614_v10, 1  ;;  %v529_v22 = vadd.f32 %v521_v8, %v489_v7  ;;  %v658_v28 = vrot.slane %v343_v5, 3  ;;  %v514_v29 = vmul.f32 %v500_v56, %v339_v54 }
 0x106   : > { %v624_v24 = vrot.slane %v616_v16, 1  ;;  %v531_v30 = vadd.f32 %v523_v14, %v491_v13  ;;  %v642_v33 = vrot.slane %v634_v15, 2  ;;  %v490_v35 = vadd.f32 %v482_v25, %v450_v21 }
 0x107   : > { %v630_v27 = vadd.f32 %v622_v19, %v610_v18  ;;  %v644_v36 = vrot.slane %v636_v20, 2  ;;  %v522_v37 = vrot.slane %v514_v29, 2  ;;  %v615_v38 = vmul.f32 %v460_v50, %v345_v12 }
 0x108   : > { %v632_v34 = vadd.f32 %v624_v24, %v612_v23  ;;  %v635_v39 = vmul.f32 %v500_v56, %v345_v12  ;;  %v545_v40 = vadd.f32 %v537_v2, %v529_v22  ;;  %v611_v42 = vmul.f32 %v436_v55, %v345_v12 }
 0x109   : > { %v650_v41 = vadd.f32 %v642_v33, %v630_v27  ;;  %v476_v43 = vmul.f32 %v468_v61, %v949_v59  ;;  %v530_v45 = vadd.f32 %v522_v37, %v490_v35  ;;  %v623_v46 = vrot.slane %v615_v38, 1 }
 0x10a   : > { %v652_v44 = vadd.f32 %v644_v36, %v632_v34  ;;  %v659_v48 = vrot.slane %v345_v12, 3  ;;  %v643_v49 = vrot.slane %v635_v39, 2  ;;  %v452_v51 = vmul.f32 %v444_v60, %v949_v59 }
 0x10b   : > { %v484_v52 = vrot.slane %v476_v43, 1  ;;  %v516_v53 = vmul.f32 %v508_v1, %v949_v59  ;;  %v546_v54 = vadd.f32 %v538_v26, %v530_v45  ;;  %v631_v57 = vadd.f32 %v623_v46, %v611_v42 }
 0x10c   : > { %v617_v50 = vmul.f32 %v468_v61, %v954_v17  ;;  %v637_v56 = vmul.f32 %v508_v1, %v954_v17  ;;  %v666_v58 = vadd.f32 %v658_v28, %v650_v41  ;;  %v613_v63 = vmul.f32 %v444_v60, %v954_v17 }
 0x10d   : > { %v492_v55 = vadd.f32 %v484_v52, %v452_v51  ;;  %v524_v62 = vrot.slane %v516_v53, 2  ;;  %v553_v2 = vcombine.low %v545_v40, %v546_v54  ;;  %v583_v3 = vcombine.high %v545_v40, %v546_v54 }
 0x10e   : > { %v651_v4 = vadd.f32 %v643_v49, %v631_v57  ;;  %v625_v5 = vrot.slane %v617_v50, 1  ;;  %v547_v6 = vadd.f32 %v539_v9, %v531_v30  ;;  %v540_v7 = vrot.slane %v949_v59, 3 }
 0x10f   : > { %v560_v8 = vsub.s32 %v557_v0, %v930_v32  ;;  %v532_v10 = vadd.f32 %v524_v62, %v492_v55  ;;  %v660_v61 = vrot.slane %v420_v11, 3  ;;  %v645_v13 = vrot.slane %v637_v56, 2 }
 0x110   : > { %v667_v12 = vadd.f32 %v659_v48, %v651_v4  ;;  %v633_v1 = vadd.f32 %v625_v5, %v613_v63  ;;  %v661_v18 = vrot.slane %v954_v17, 3 }
 0x111   : > { %v548_v14 = vadd.f32 %v540_v7, %v532_v10  ;;  %v668_v15 = vadd.f32 %v660_v61, %v652_v44  ;;  %v561_v19 = vrot.slane %v553_v2, %v560_v8  ;;  %v591_v9 = vrot.slane %v583_v3, %v560_v8 }
 0x112   : > { %v674_v60 = vcombine.low %v666_v58, %v667_v12  ;;  %v653_v16 = vadd.f32 %v645_v13, %v633_v1 }
 0x113   : > { %v554_v20 = vcombine.low %v547_v6, %v548_v14  ;;  %v584_v59 = vcombine.high %v547_v6, %v548_v14 }
 0x114   : > { %v669_v21 = vadd.f32 %v661_v18, %v653_v16  ;;  %v682_v32 = vrot.slane %v674_v60, %v560_v8 }
 0x115   : > { %v568_v22 = vrot.slane %v554_v20, %v560_v8  ;;  %v598_v47 = vrot.slane %v584_v59, %v560_v8 }
 0x116   : > { %v675_v0 = vcombine.low %v668_v15, %v669_v21 }
 0x117   : > { %v569_v11 = vcombine.low %v561_v19, %v568_v22  ;;  %v599_v23 = vcombine.low %v591_v9, %v598_v47 }
 0x118   : > { %v689_v24 = vrot.slane %v675_v0, %v560_v8 }
 0x119   : > { %v576_v17 = vrot.slane %v569_v11, %v560_v8  ;;  %v606_v25 = vrot.slane %v599_v23, %v560_v8 }
 0x11a   : > { %v690_v26 = vcombine.low %v682_v32, %v689_v24 }
 0x11b   : > { %582 = vst.msk [vmem:[%s235_s15] ss:$4 sm:$0xf] %vm580_vm2, %v576_v17  ;;  %794 = vst.msk [vmem:[%s235_s15 + $0x1] ss:$4 sm:$0xf] %vm580_vm2, %v606_v25 }
 0x11c   : > { %v697_v27 = vrot.slane %v690_v26, %v560_v8 }
 0x11e   : > { %795 = vst.msk [vmem:[%s235_s15 + $0x2] ss:$4 sm:$0xf] %vm580_vm2, %v697_v27 }
 0x11f PF: > { %p10_p9 = scmp.ge.s32.totalorder %s898_s16, 4   ;;  %s987_s12 = smov %s853_s13 }
 0x120   : > { %s988_s13 = smov %s907_s19  ;;  %s989_s14 = smov %s898_s16 }
 0x121   :  { %12 = sbr.rel (!%p10_p9) target bundleno = 2 (0x2), region = 95 }

</bundles_post_ra>
